<compile_context>
chip_gen: v6e
topology: v6e:2x2x1
jax: 0.10.0
libtpu: 0.0.40
codegen_flags: <defaults>
</compile_context>

<pallas_src>
import jax
import jax.numpy as jnp
from jax.experimental import pallas as pl
from jax.experimental.pallas import tpu as pltpu


def round_up(x, m):
    return (x + m - 1) // m * m


def cdiv(a, b):
    return (a + b - 1) // b


# --------------------------------------------------------------------------
# Kernel
# --------------------------------------------------------------------------
def vae_kernel(x_ref, t_ref,
               w1_ref, b1_ref, w2_ref, b2_ref,
               w3_ref, b3_ref, w4_ref, b4_ref,
               recon_ref, mulv_ref):
    l_pad = t_ref.shape[-1]               # static (padded latent dim)

    x = x_ref[...]                        # (TB, D_pad) bf16

    # ---- encode --------------------------------------------------------
    h1 = jnp.dot(x, w1_ref[...], preferred_element_type=jnp.float32)
    h1 = jnp.maximum(h1 + b1_ref[...], 0.0)                       # relu (f32)

    # fused [mu | logvar] head: single MXU push instead of two
    mulv = jnp.dot(h1.astype(jnp.bfloat16), w2_ref[...],
                   preferred_element_type=jnp.float32) + b2_ref[...]
    mu = mulv[:, :l_pad]
    logvar = mulv[:, l_pad:]

    # ---- reparameterize: z = mu + std * t,  t ~ StudentT(df=v) ---------
    std = jnp.exp(0.5 * logvar)
    z = mu + std * t_ref[...]

    # ---- decode --------------------------------------------------------
    h3 = jnp.dot(z.astype(jnp.bfloat16), w3_ref[...],
                 preferred_element_type=jnp.float32)
    h3 = jnp.maximum(h3 + b3_ref[...], 0.0)                       # relu (f32)
    logits = jnp.dot(h3.astype(jnp.bfloat16), w4_ref[...],
                     preferred_element_type=jnp.float32) + b4_ref[...]

    recon_ref[...] = jax.nn.sigmoid(logits).astype(recon_ref.dtype)  # EUP exp
    mulv_ref[...] = mulv.astype(mulv_ref.dtype)


# --------------------------------------------------------------------------
# Parameter preprocessing (one time, hoisted out of the forward call)
# --------------------------------------------------------------------------
def init_linear(key, in_dim, out_dim):
    """PyTorch-style uniform(+-1/sqrt(in)) Linear init.

    W returned as (in_dim, out_dim) (pre-transposed for x @ W), b as (1, out).
    """
    kw, kb = jax.random.split(key)
    bound = 1.0 / jnp.sqrt(jnp.float32(in_dim))
    w = jax.random.uniform(kw, (in_dim, out_dim), jnp.float32, -bound, bound)
    b = jax.random.uniform(kb, (1, out_dim), jnp.float32, -bound, bound)
    return w, b


def _pad2(a, rows, cols):
    return jnp.pad(a, ((0, rows - a.shape[0]), (0, cols - a.shape[1])))


def prepare_params(params):
    """Pad weights to lane-dense 128 multiples, fuse [mu|logvar] head, cast to
    bf16.  Done ONCE; the returned dict is reused across forward calls."""
    (w1, b1), (w21, b21), (w22, b22), (w3, b3), (w4, b4) = params
    D_in, H = w1.shape
    L = w21.shape[1]

    D_pad = round_up(D_in, 128)
    H_pad = round_up(H, 128)
    L_pad = round_up(L, 128)

    prepped = {
        "dims": (D_in, H, L, D_pad, H_pad, L_pad),
        # weights: zero-padded, pre-transposed, bf16 (MXU-native)
        "w1": _pad2(w1, D_pad, H_pad).astype(jnp.bfloat16),
        "w2": jnp.concatenate(                      # fused [mu | logvar] head
            [_pad2(w21, H_pad, L_pad), _pad2(w22, H_pad, L_pad)],
            axis=1).astype(jnp.bfloat16),
        "w3": _pad2(w3, L_pad, H_pad).astype(jnp.bfloat16),
        "w4": _pad2(w4, H_pad, D_pad).astype(jnp.bfloat16),
        # biases: f32 (added after f32 accumulation)
        "b1": _pad2(b1, 1, H_pad),
        "b2": jnp.concatenate(
            [_pad2(b21, 1, L_pad), _pad2(b22, 1, L_pad)], axis=1),
        "b3": _pad2(b3, 1, H_pad),
        "b4": _pad2(b4, 1, D_pad),
    }
    return jax.tree_util.tree_map(jax.block_until_ready, prepped)


# --------------------------------------------------------------------------
# Forward
# --------------------------------------------------------------------------
def vae_forward(x, t_noise, prepped, *, tile_b=512):
    D_in, H, L, D_pad, H_pad, L_pad = prepped["dims"]
    B = x.shape[0]

    # ---- batch tiling --------------------------------------------------
    # Minimal-waste tile count, then force >=2 tiles when possible so the
    # "parallel" grid axis can actually shard across v7x's two TensorCores.
    n_tiles = cdiv(B, tile_b)
    if n_tiles == 1 and B > 16:
        n_tiles = 2
    TB = round_up(cdiv(B, n_tiles), 16)      # multiple of 16 (bf16 sublanes)
    B_pad = TB * n_tiles
    grid = (n_tiles,)

    # activations / noise: zero-pad (zero noise in padded latent dims -> z=0)
    xp = _pad2(x, B_pad, D_pad).astype(jnp.bfloat16)   # only feeds bf16 matmul
    tp = _pad2(t_noise, B_pad, L_pad)                  # f32 (elementwise path)

    def batch_spec(n):
        return pl.BlockSpec((TB, n), lambda i: (i, 0))

    def whole_spec(shape):
        # constant block index -> weight tile DMA'd once, stays resident
        return pl.BlockSpec(shape, lambda i: (0, 0))

    recon_p, mulv_p = pl.pallas_call(
        vae_kernel,
        grid=grid,
        out_shape=(
            jax.ShapeDtypeStruct((B_pad, D_pad), jnp.bfloat16),     # recon
            jax.ShapeDtypeStruct((B_pad, 2 * L_pad), jnp.float32),  # [mu|logvar]
        ),
        in_specs=[
            batch_spec(D_pad),          # x
            batch_spec(L_pad),          # t noise
            whole_spec(prepped["w1"].shape), whole_spec(prepped["b1"].shape),
            whole_spec(prepped["w2"].shape), whole_spec(prepped["b2"].shape),
            whole_spec(prepped["w3"].shape), whole_spec(prepped["b3"].shape),
            whole_spec(prepped["w4"].shape), whole_spec(prepped["b4"].shape),
        ],
        out_specs=(batch_spec(D_pad), batch_spec(2 * L_pad)),
        compiler_params=pltpu.CompilerParams(
            dimension_semantics=("parallel",),      # megacore split on v7x
            # no vmem_limit override: footprint is a few MiB, scoped default
            # is ample on v5e/v6e/v7x.
        ),
    )(xp, tp,
      prepped["w1"], prepped["b1"], prepped["w2"], prepped["b2"],
      prepped["w3"], prepped["b3"], prepped["w4"], prepped["b4"])

    recon = recon_p[:B, :D_in].astype(jnp.float32)
    mu = mulv_p[:B, :L]
    logvar = mulv_p[:B, L_pad:L_pad + L]
    return recon, mu, logvar


# --------------------------------------------------------------------------
# Demo / self-test
# --------------------------------------------------------------------------
if __name__ == "__main__":
    # small shapes consistent with the module
    batch, input_dim, hidden_dim, latent_dim = 8, 16, 32, 8

    key = jax.random.PRNGKey(0)
    k_x, k_t, k1, k21, k22, k3, k4 = jax.random.split(key, 7)

    # parameters (deterministic, synthetic)
    params = (
        init_linear(k1, input_dim, hidden_dim),    # fc1
        init_linear(k21, hidden_dim, latent_dim),  # fc21
        init_linear(k22, hidden_dim, latent_dim),  # fc22
        init_linear(k3, latent_dim, hidden_dim),   # fc3
        init_linear(k4, hidden_dim, input_dim),    # fc4
    )
    v = jnp.float32(4.0)  # StudentT degrees of freedom (nn.Parameter in torch)

    # one-time padded/bf16 parameter preprocessing (hoisted out of forward)
    prepped = prepare_params(params)

    # inputs
    x = jax.random.normal(k_x, (batch, input_dim), jnp.float32)
    # TODO(synk): Student-t sampling (gamma/chi2) has no Pallas primitive;
    # standard-t noise is drawn host-side and the affine reparameterization
    # (loc=mu, scale=std) is fused into the kernel.
    t_noise = jax.random.t(k_t, v, (batch, latent_dim), jnp.float32)

    recon, mu, logvar = vae_forward(x, t_noise, prepped)
    jax.block_until_ready((recon, mu, logvar))

    # sanity checks against a pure-JAX f32 reference (kernel uses bf16 matmul
    # inputs / bf16 recon writeback with f32 accumulation -> loosened tol)
    def ref_forward(x, t_noise, params):
        (w1, b1), (w21, b21), (w22, b22), (w3, b3), (w4, b4) = params
        h1 = jnp.maximum(x @ w1 + b1, 0.0)
        mu = h1 @ w21 + b21
        logvar = h1 @ w22 + b22
        z = mu + jnp.exp(0.5 * logvar) * t_noise
        h3 = jnp.maximum(z @ w3 + b3, 0.0)
        return jax.nn.sigmoid(h3 @ w4 + b4), mu, logvar

    r_ref, mu_ref_, lv_ref = ref_forward(x, t_noise, params)
    assert recon.shape == (batch, input_dim)
    assert mu.shape == (batch, latent_dim) and logvar.shape == (batch, latent_dim)
    assert jnp.allclose(recon, r_ref, atol=2e-2), "recon mismatch"
    assert jnp.allclose(mu, mu_ref_, atol=2e-2), "mu mismatch"
    assert jnp.allclose(logvar, lv_ref, atol=2e-2), "logvar mismatch"

    print("KERNEL_OK")
</pallas_src>

<mosaic_0001>
module attributes {stable_mosaic.version = 11 : i64} {
  func.func @vae_kernel(%arg0: i32, %arg1: memref<16x128xbf16, #tpu.memory_space<vmem>>, %arg2: memref<16x128xf32, #tpu.memory_space<vmem>>, %arg3: memref<128x128xbf16, #tpu.memory_space<vmem>>, %arg4: memref<1x128xf32, #tpu.memory_space<vmem>>, %arg5: memref<128x256xbf16, #tpu.memory_space<vmem>>, %arg6: memref<1x256xf32, #tpu.memory_space<vmem>>, %arg7: memref<128x128xbf16, #tpu.memory_space<vmem>>, %arg8: memref<1x128xf32, #tpu.memory_space<vmem>>, %arg9: memref<128x128xbf16, #tpu.memory_space<vmem>>, %arg10: memref<1x128xf32, #tpu.memory_space<vmem>>, %arg11: memref<16x128xbf16, #tpu.memory_space<vmem>>, %arg12: memref<16x256xf32, #tpu.memory_space<vmem>>) attributes {dimension_semantics = [#tpu.dimension_semantics<parallel>], iteration_bounds = array<i64: 1>, scalar_prefetch = 0 : i64, scratch_operands = 0 : i64, tpu.core_type = #tpu.core_type<tc>, window_params = [{transform_indices = @transform_0, window_bounds = array<i64: 16, 128>}, {transform_indices = @transform_1, window_bounds = array<i64: 16, 128>}, {pipeline_mode = #tpu.pipeline_mode<synchronous>, transform_indices = @transform_2, window_bounds = array<i64: 128, 128>}, {pipeline_mode = #tpu.pipeline_mode<synchronous>, transform_indices = @transform_3, window_bounds = array<i64: 1, 128>}, {pipeline_mode = #tpu.pipeline_mode<synchronous>, transform_indices = @transform_4, window_bounds = array<i64: 128, 256>}, {pipeline_mode = #tpu.pipeline_mode<synchronous>, transform_indices = @transform_5, window_bounds = array<i64: 1, 256>}, {pipeline_mode = #tpu.pipeline_mode<synchronous>, transform_indices = @transform_6, window_bounds = array<i64: 128, 128>}, {pipeline_mode = #tpu.pipeline_mode<synchronous>, transform_indices = @transform_7, window_bounds = array<i64: 1, 128>}, {pipeline_mode = #tpu.pipeline_mode<synchronous>, transform_indices = @transform_8, window_bounds = array<i64: 128, 128>}, {pipeline_mode = #tpu.pipeline_mode<synchronous>, transform_indices = @transform_9, window_bounds = array<i64: 1, 128>}, {transform_indices = @transform_10, window_bounds = array<i64: 16, 128>}, {transform_indices = @transform_11, window_bounds = array<i64: 16, 256>}]} {
    %c0 = arith.constant 0 : index
    %c0_0 = arith.constant 0 : index
    %0 = vector.load %arg1[%c0, %c0_0] : memref<16x128xbf16, #tpu.memory_space<vmem>>, vector<16x128xbf16>
    %c0_1 = arith.constant 0 : index
    %c0_2 = arith.constant 0 : index
    %1 = vector.load %arg3[%c0_1, %c0_2] : memref<128x128xbf16, #tpu.memory_space<vmem>>, vector<128x128xbf16>
    %cst = arith.constant dense<0.000000e+00> : vector<16x128xf32>
    %2 = tpu.matmul %0, %1, %cst {dimension_numbers = #tpu.dot_dimension_numbers<[1], [0], [0], [1], [0, 0, 1, 1], [], []>} : vector<16x128xbf16>, vector<128x128xbf16>, vector<16x128xf32> -> vector<16x128xf32>
    %c0_3 = arith.constant 0 : index
    %c0_4 = arith.constant 0 : index
    %3 = vector.load %arg4[%c0_3, %c0_4] : memref<1x128xf32, #tpu.memory_space<vmem>>, vector<1x128xf32>
    %4 = vector.broadcast %3 : vector<1x128xf32> to vector<16x128xf32>
    %5 = arith.addf %2, %4 : vector<16x128xf32>
    %cst_5 = arith.constant 0.000000e+00 : f32
    %6 = vector.broadcast %cst_5 : f32 to vector<16x128xf32>
    %7 = arith.maximumf %5, %6 : vector<16x128xf32>
    %8 = arith.truncf %7 : vector<16x128xf32> to vector<16x128xbf16>
    %c0_6 = arith.constant 0 : index
    %c0_7 = arith.constant 0 : index
    %9 = vector.load %arg5[%c0_6, %c0_7] : memref<128x256xbf16, #tpu.memory_space<vmem>>, vector<128x256xbf16>
    %cst_8 = arith.constant dense<0.000000e+00> : vector<16x256xf32>
    %10 = tpu.matmul %8, %9, %cst_8 {dimension_numbers = #tpu.dot_dimension_numbers<[1], [0], [0], [1], [0, 0, 1, 1], [], []>} : vector<16x128xbf16>, vector<128x256xbf16>, vector<16x256xf32> -> vector<16x256xf32>
    %c0_9 = arith.constant 0 : index
    %c0_10 = arith.constant 0 : index
    %11 = vector.load %arg6[%c0_9, %c0_10] : memref<1x256xf32, #tpu.memory_space<vmem>>, vector<1x256xf32>
    %12 = vector.broadcast %11 : vector<1x256xf32> to vector<16x256xf32>
    %13 = arith.addf %10, %12 : vector<16x256xf32>
    %14 = vector.extract_strided_slice %13 {offsets = [0, 0], sizes = [16, 128], strides = [1, 1]} : vector<16x256xf32> to vector<16x128xf32>
    %15 = vector.extract_strided_slice %13 {offsets = [0, 128], sizes = [16, 128], strides = [1, 1]} : vector<16x256xf32> to vector<16x128xf32>
    %cst_11 = arith.constant 5.000000e-01 : f32
    %16 = vector.broadcast %cst_11 : f32 to vector<16x128xf32>
    %17 = arith.mulf %16, %15 : vector<16x128xf32>
    %18 = math.exp %17 : vector<16x128xf32>
    %c0_12 = arith.constant 0 : index
    %c0_13 = arith.constant 0 : index
    %19 = vector.load %arg2[%c0_12, %c0_13] : memref<16x128xf32, #tpu.memory_space<vmem>>, vector<16x128xf32>
    %20 = arith.mulf %18, %19 : vector<16x128xf32>
    %21 = arith.addf %14, %20 : vector<16x128xf32>
    %22 = arith.truncf %21 : vector<16x128xf32> to vector<16x128xbf16>
    %c0_14 = arith.constant 0 : index
    %c0_15 = arith.constant 0 : index
    %23 = vector.load %arg7[%c0_14, %c0_15] : memref<128x128xbf16, #tpu.memory_space<vmem>>, vector<128x128xbf16>
    %cst_16 = arith.constant dense<0.000000e+00> : vector<16x128xf32>
    %24 = tpu.matmul %22, %23, %cst_16 {dimension_numbers = #tpu.dot_dimension_numbers<[1], [0], [0], [1], [0, 0, 1, 1], [], []>} : vector<16x128xbf16>, vector<128x128xbf16>, vector<16x128xf32> -> vector<16x128xf32>
    %c0_17 = arith.constant 0 : index
    %c0_18 = arith.constant 0 : index
    %25 = vector.load %arg8[%c0_17, %c0_18] : memref<1x128xf32, #tpu.memory_space<vmem>>, vector<1x128xf32>
    %26 = vector.broadcast %25 : vector<1x128xf32> to vector<16x128xf32>
    %27 = arith.addf %24, %26 : vector<16x128xf32>
    %cst_19 = arith.constant 0.000000e+00 : f32
    %28 = vector.broadcast %cst_19 : f32 to vector<16x128xf32>
    %29 = arith.maximumf %27, %28 : vector<16x128xf32>
    %30 = arith.truncf %29 : vector<16x128xf32> to vector<16x128xbf16>
    %c0_20 = arith.constant 0 : index
    %c0_21 = arith.constant 0 : index
    %31 = vector.load %arg9[%c0_20, %c0_21] : memref<128x128xbf16, #tpu.memory_space<vmem>>, vector<128x128xbf16>
    %cst_22 = arith.constant dense<0.000000e+00> : vector<16x128xf32>
    %32 = tpu.matmul %30, %31, %cst_22 {dimension_numbers = #tpu.dot_dimension_numbers<[1], [0], [0], [1], [0, 0, 1, 1], [], []>} : vector<16x128xbf16>, vector<128x128xbf16>, vector<16x128xf32> -> vector<16x128xf32>
    %c0_23 = arith.constant 0 : index
    %c0_24 = arith.constant 0 : index
    %33 = vector.load %arg10[%c0_23, %c0_24] : memref<1x128xf32, #tpu.memory_space<vmem>>, vector<1x128xf32>
    %34 = vector.broadcast %33 : vector<1x128xf32> to vector<16x128xf32>
    %35 = arith.addf %32, %34 : vector<16x128xf32>
    %36 = arith.negf %35 : vector<16x128xf32>
    %37 = math.exp %36 : vector<16x128xf32>
    %cst_25 = arith.constant 1.000000e+00 : f32
    %38 = vector.broadcast %cst_25 : f32 to vector<16x128xf32>
    %39 = arith.addf %38, %37 : vector<16x128xf32>
    %40 = arith.divf %38, %39 : vector<16x128xf32>
    %41 = arith.truncf %40 : vector<16x128xf32> to vector<16x128xbf16>
    %c0_26 = arith.constant 0 : index
    %c0_27 = arith.constant 0 : index
    %42 = vector.load %arg11[%c0_26, %c0_27] : memref<16x128xbf16, #tpu.memory_space<vmem>>, vector<16x128xbf16>
    tpu.vector_store %arg11[%c0_26, %c0_27], %41 {strides = array<i32>} : memref<16x128xbf16, #tpu.memory_space<vmem>>, vector<16x128xbf16>,
    %c0_28 = arith.constant 0 : index
    %c0_29 = arith.constant 0 : index
    %43 = vector.load %arg12[%c0_28, %c0_29] : memref<16x256xf32, #tpu.memory_space<vmem>>, vector<16x256xf32>
    tpu.vector_store %arg12[%c0_28, %c0_29], %13 {strides = array<i32>} : memref<16x256xf32, #tpu.memory_space<vmem>>, vector<16x256xf32>,
    return
  }
  func.func @transform_0(%arg0: i32) -> (i32, i32) {
    %c0_i32 = arith.constant 0 : i32
    %c0_i32_0 = arith.constant 0 : i32
    return %arg0, %c0_i32 : i32, i32
  }
  func.func @transform_1(%arg0: i32) -> (i32, i32) {
    %c0_i32 = arith.constant 0 : i32
    %c0_i32_0 = arith.constant 0 : i32
    return %arg0, %c0_i32 : i32, i32
  }
  func.func @transform_2(%arg0: i32) -> (i32, i32) {
    %c0_i32 = arith.constant 0 : i32
    %c0_i32_0 = arith.constant 0 : i32
    %c0_i32_1 = arith.constant 0 : i32
    return %c0_i32, %c0_i32_0 : i32, i32
  }
  func.func @transform_3(%arg0: i32) -> (i32, i32) {
    %c0_i32 = arith.constant 0 : i32
    %c0_i32_0 = arith.constant 0 : i32
    %c0_i32_1 = arith.constant 0 : i32
    return %c0_i32, %c0_i32_0 : i32, i32
  }
  func.func @transform_4(%arg0: i32) -> (i32, i32) {
    %c0_i32 = arith.constant 0 : i32
    %c0_i32_0 = arith.constant 0 : i32
    %c0_i32_1 = arith.constant 0 : i32
    return %c0_i32, %c0_i32_0 : i32, i32
  }
  func.func @transform_5(%arg0: i32) -> (i32, i32) {
    %c0_i32 = arith.constant 0 : i32
    %c0_i32_0 = arith.constant 0 : i32
    %c0_i32_1 = arith.constant 0 : i32
    return %c0_i32, %c0_i32_0 : i32, i32
  }
  func.func @transform_6(%arg0: i32) -> (i32, i32) {
    %c0_i32 = arith.constant 0 : i32
    %c0_i32_0 = arith.constant 0 : i32
    %c0_i32_1 = arith.constant 0 : i32
    return %c0_i32, %c0_i32_0 : i32, i32
  }
  func.func @transform_7(%arg0: i32) -> (i32, i32) {
    %c0_i32 = arith.constant 0 : i32
    %c0_i32_0 = arith.constant 0 : i32
    %c0_i32_1 = arith.constant 0 : i32
    return %c0_i32, %c0_i32_0 : i32, i32
  }
  func.func @transform_8(%arg0: i32) -> (i32, i32) {
    %c0_i32 = arith.constant 0 : i32
    %c0_i32_0 = arith.constant 0 : i32
    %c0_i32_1 = arith.constant 0 : i32
    return %c0_i32, %c0_i32_0 : i32, i32
  }
  func.func @transform_9(%arg0: i32) -> (i32, i32) {
    %c0_i32 = arith.constant 0 : i32
    %c0_i32_0 = arith.constant 0 : i32
    %c0_i32_1 = arith.constant 0 : i32
    return %c0_i32, %c0_i32_0 : i32, i32
  }
  func.func @transform_10(%arg0: i32) -> (i32, i32) {
    %c0_i32 = arith.constant 0 : i32
    %c0_i32_0 = arith.constant 0 : i32
    return %arg0, %c0_i32 : i32, i32
  }
  func.func @transform_11(%arg0: i32) -> (i32, i32) {
    %c0_i32 = arith.constant 0 : i32
    %c0_i32_0 = arith.constant 0 : i32
    return %arg0, %c0_i32 : i32, i32
  }
}

</mosaic_0001>

<bundles_post_ra>
// kernel: tpu_custom_call.1
= control target key start
LH: loop header
LB: loop body
LE: loop exit
PB: predicated region body
PF: predicated region fallthrough
CT: control target
= control target key end

     0   :  { %17 = vsyncpa [#allocation3], 0  ;;  %s1248_s0 = inlined_call_operand.hbm [shape: bf16[16,128], index: 0, kind: input, shape index: {}]   ;;  %s1249_s1 = inlined_call_operand.hbm [shape: f32[16,128], index: 1, kind: input, shape index: {}]   ;;  %s1250_s2 = inlined_call_operand.hbm [shape: bf16[128,128], index: 2, kind: input, shape index: {}]   ;;  %s1251_s3 = inlined_call_operand.vmem [shape: f32[1,128], index: 3, kind: input, shape index: {}]   ;;  %s1252_s4 = inlined_call_operand.hbm [shape: bf16[128,256], index: 4, kind: input, shape index: {}]   ;;  %s1253_s5 = inlined_call_operand.vmem [shape: f32[1,256], index: 5, kind: input, shape index: {}]   ;;  %s1254_s6 = inlined_call_operand.hbm [shape: bf16[128,128], index: 6, kind: input, shape index: {}]   ;;  %s1255_s7 = inlined_call_operand.vmem [shape: f32[1,128], index: 7, kind: input, shape index: {}]   ;;  %s1256_s8 = inlined_call_operand.hbm [shape: bf16[128,128], index: 8, kind: input, shape index: {}]   ;;  %s1257_s9 = inlined_call_operand.vmem [shape: f32[1,128], index: 9, kind: input, shape index: {}]   ;;  %s1258_s10 = inlined_call_operand.hbm [shape: bf16[16,128], index: 10, kind: output, shape index: {0}]   ;;  %s1259_s11 = inlined_call_operand.hbm [shape: f32[16,256], index: 11, kind: output, shape index: {1}]  }
   0x1   :  { %18 = vsyncpa [#allocation6], 0 }
   0x2   :  { %19 = vsyncpa [#allocation9], 0 }
   0x3   :  { %20 = vsyncpa [#allocation12], 0 }
   0x4   :  { %21 = vsyncpa [#allocation4], 0 }
   0x5   :  { %22 = vsyncpa [#allocation15], 0  ;;  %s1090_s17 = smov [#allocation5]  }
   0x6   :  { %s40_s18 = sshll.u32 %s1090_s17, 4  ;;  %s41_s18 = int_to_ptr.vmem [resolvable:$true] %s40_s18 }
   0x7   :  { %s926_s19 = scalar_lea.vmem %s41_s18, 256  ;;  %p931_p1 = scmp.lt.s32.totalorder %s41_s18, %s41_s18 }
   0x8   :  { %p927_p0 = scmp.ne.s32.totalorder %s41_s18, %s926_s19  ;;  %p932_p2 = scmp.lt.s32.totalorder %s926_s19, %s926_s19 }
   0xa   :  { %p933_p3 = por %p932_p2, %p931_p1 }
   0xc   :  { %p934_p4 = pnand %p933_p3, %p927_p0 }
   0xe   :  { %937 = shalt.err (!%p934_p4)
}
   0xf   :  { %s1091_s20 = smov 128   ;;  %s1092_s21 = smov 8  }
  0x10   :  { %46 = dma.hbm_to_vmem [thread:$0]  %s1249_s1, 256, %s41_s18, [#allocation6], %s1091_s20, %s1091_s20, %s1092_s21  }
  0x11   :  { %s1093_s24 = smov [#allocation8]   ;;  %s1094_s26 = smov [#allocation2]  }
  0x12   :  { %s66_s25 = sshll.u32 %s1093_s24, 4  ;;  %s28_s27 = sshll.u32 %s1094_s26, 4  ;;  %s67_s25 = int_to_ptr.vmem [resolvable:$true] %s66_s25  ;;  %s29_s27 = int_to_ptr.vmem [resolvable:$true] %s28_s27 }
  0x13   :  { %s946_s28 = scalar_lea.vmem %s67_s25, 2048  ;;  %p951_p6 = scmp.lt.s32.totalorder %s67_s25, %s67_s25 }
  0x14   :  { %p947_p5 = scmp.ne.s32.totalorder %s67_s25, %s946_s28  ;;  %p952_p7 = scmp.lt.s32.totalorder %s946_s28, %s946_s28 }
  0x16   :  { %p953_p8 = por %p952_p7, %p951_p6 }
  0x18   :  { %p954_p9 = pnand %p953_p8, %p947_p5 }
  0x1a   :  { %957 = shalt.err (!%p954_p9)
}
  0x1b   :  { %72 = dma.hbm_to_vmem [thread:$0]  %s1252_s4, 2048, %s67_s25, [#allocation9], %s1091_s20, %s1091_s20, %s1092_s21  }
  0x1c   :  { %s966_s12 = scalar_lea.vmem %s29_s27, 128  ;;  %p971_p11 = scmp.lt.s32.totalorder %s29_s27, %s29_s27 }
  0x1d   :  { %p967_p10 = scmp.ne.s32.totalorder %s29_s27, %s966_s12  ;;  %p972_p12 = scmp.lt.s32.totalorder %s966_s12, %s966_s12 }
  0x1f   :  { %p973_p13 = por %p972_p12, %p971_p11 }
  0x21   :  { %p974_p0 = pnand %p973_p13, %p967_p10 }
  0x23   :  { %977 = shalt.err (!%p974_p0)
}
  0x24   :  { %s1095_s1 = smov 64   ;;  %s1096_s13 = smov 4  }
  0x25   :  { %34 = dma.hbm_to_vmem [thread:$0]  %s1248_s0, 128, %s29_s27, [#allocation3], %s1095_s1, %s1095_s1, %s1096_s13  }
  0x26   :  { %s1097_s16 = smov [#allocation7]   ;;  %s1098_s4 = smov [#allocation10]  }
  0x27   :  { %s52_s17 = sshll.u32 %s1097_s16, 4  ;;  %s80_s18 = sshll.u32 %s1098_s4, 4  ;;  %s53_s17 = int_to_ptr.vmem [resolvable:$true] %s52_s17  ;;  %s81_s18 = int_to_ptr.vmem [resolvable:$true] %s80_s18 }
  0x28   :  { %s986_s19 = scalar_lea.vmem %s53_s17, 1024  ;;  %p991_p2 = scmp.lt.s32.totalorder %s53_s17, %s53_s17 }
  0x29   :  { %p987_p1 = scmp.ne.s32.totalorder %s53_s17, %s986_s19  ;;  %p992_p3 = scmp.lt.s32.totalorder %s986_s19, %s986_s19 }
  0x2b   :  { %p993_p4 = por %p992_p3, %p991_p2 }
  0x2d   :  { %p994_p5 = pnand %p993_p4, %p987_p1 }
  0x2f   :  { %997 = shalt.err (!%p994_p5)
}
  0x30   :  { %58 = dma.hbm_to_vmem [thread:$0]  %s1250_s2, 1024, %s53_s17, [#allocation6], %s1095_s1, %s1095_s1, %s1096_s13  }
  0x31   :  { %s1006_s0 = scalar_lea.vmem %s81_s18, 1024  ;;  %p1011_p7 = scmp.lt.s32.totalorder %s81_s18, %s81_s18 }
  0x32   :  { %p1007_p6 = scmp.ne.s32.totalorder %s81_s18, %s1006_s0  ;;  %p1012_p8 = scmp.lt.s32.totalorder %s1006_s0, %s1006_s0 }
  0x34   :  { %p1013_p9 = por %p1012_p8, %p1011_p7 }
  0x36   :  { %p1014_p10 = pnand %p1013_p9, %p1007_p6 }
  0x38   :  { %1017 = shalt.err (!%p1014_p10)
}
  0x39   :  { %86 = dma.hbm_to_vmem [thread:$0]  %s1254_s6, 1024, %s81_s18, [#allocation9], %s1095_s1, %s1095_s1, %s1096_s13  }
  0x3a   :  { %s1099_s24 = smov [#allocation11]  }
  0x3b   :  { %s94_s25 = sshll.u32 %s1099_s24, 4  ;;  %s95_s25 = int_to_ptr.vmem [resolvable:$true] %s94_s25 }
  0x3c   :  { %s1026_s26 = scalar_lea.vmem %s95_s25, 1024  ;;  %p1031_p12 = scmp.lt.s32.totalorder %s95_s25, %s95_s25 }
  0x3d   :  { %p1027_p11 = scmp.ne.s32.totalorder %s95_s25, %s1026_s26  ;;  %p1032_p13 = scmp.lt.s32.totalorder %s1026_s26, %s1026_s26 }
  0x3f   :  { %p1033_p0 = por %p1032_p13, %p1031_p12 }
  0x41   :  { %p1034_p1 = pnand %p1033_p0, %p1027_p11 }
  0x43   :  { %1037 = shalt.err (!%p1034_p1)
}
  0x44   :  { %100 = dma.hbm_to_vmem [thread:$0]  %s1256_s8, 1024, %s95_s25, [#allocation12], %s1095_s1, %s1095_s1, %s1096_s13  }
  0x45   :  { %1078 = dma.done.wait [#allocation3], 128  }
  0x46   :  { %1079 = vsyncadd [#allocation3], 4294967168 }
  0x47   :  { %1080 = dma.done.wait [#allocation6], 1280  }
  0x48   :  { %1081 = vsyncadd [#allocation6], 4294966016 }
  0x49   :  { %1082 = dma.done.wait [#allocation9], 3072  }
  0x4a   :  { %1083 = vsyncadd [#allocation9], 4294964224 }
  0x4b   :  { %1084 = dma.done.wait [#allocation12], 1024  }
  0x4c   :  { %1085 = vsyncadd [#allocation12], 4294966272  ;;  %v1100_v0 = vmov 0.0   ;;  %vm1101_vm0 = vmmov 0   ;;  %v857_v1 = vld [vmem:[#allocation7 + $0x38] sm:$0xff]   ;;  %v858_v2 = vld [vmem:[#allocation7 + $0x30] sm:$0xff]   ;;  %v263_v50 = vlaneseq }
  0x4d   :  { %780 = vmatprep.subr.bf16.mxu0 %v1100_v0  ;;  %796 = vmatprep.mubr.msk.bf16.mxu0 %vm1101_vm0, %v1100_v0  ;;  %v859_v3 = vld [vmem:[#allocation7 + $0x28] sm:$0xff]   ;;  %v860_v4 = vld [vmem:[#allocation7 + $0x20] sm:$0xff]   ;;  %v866_v5 = vld [vmem:[#allocation8 + $0x74] ss:$8 sps:$4 sm:$0xff]   ;;  %v1102_v26 = vmov 0   ;;  %s1103_s30 = smov [#allocation14]  }
  0x4e   :  { %781 = vmatpush3.bf16.msra.mxu0 %v857_v1  ;;  %v868_v6 = vld [vmem:[#allocation8 + $0x70] ss:$8 sps:$4 sm:$0xff]   ;;  %353 = vmatprep.subr.bf16.mxu1 %v866_v5  ;;  %v869_v7 = vld [vmem:[#allocation8 + $0x64] ss:$8 sps:$4 sm:$0xff]   ;;  %v871_v8 = vld [vmem:[#allocation8 + $0x60] ss:$8 sps:$4 sm:$0xff]  }
  0x4f   :  { %782 = vmatprep.subr.bf16.mxu0 %v1100_v0  ;;  %354 = vmatpush1.bf16.msra.mxu1 %v868_v6  ;;  %v872_v9 = vld [vmem:[#allocation8 + $0x54] ss:$8 sps:$4 sm:$0xff]   ;;  %v874_v12 = vld [vmem:[#allocation8 + $0x50] ss:$8 sps:$4 sm:$0xff]   ;;  %v875_v13 = vld [vmem:[#allocation8 + $0x44] ss:$8 sps:$4 sm:$0xff]  }
  0x50   :  { %355 = vmatprep.subr.bf16.mxu1 %v869_v7  ;;  %v861_v10 = vld [vmem:[#allocation7 + $0x18] sm:$0xff]   ;;  %v862_v11 = vld [vmem:[#allocation7 + $0x10] sm:$0xff]   ;;  %v877_v14 = vld [vmem:[#allocation8 + $0x40] ss:$8 sps:$4 sm:$0xff]   ;;  %385 = vmatprep.mubr.bf16.mxu1 %v1102_v26  ;;  %v264_v51 = vshrl.u32 %v263_v50, 7  ;;  %s679_s12 = sshll.u32 %s1103_s30, 4  ;;  %s680_s12 = int_to_ptr.vmem [resolvable:$true] %s679_s12 }
  0x51   :  { %v878_v15 = vld [vmem:[#allocation8 + $0x34] ss:$8 sps:$4 sm:$0xff]   ;;  %v863_v16 = vld [vmem:[#allocation7 + $0x8] sm:$0xff]   ;;  %v880_v17 = vld [vmem:[#allocation8 + $0x30] ss:$8 sps:$4 sm:$0xff]   ;;  %s1038_s14 = scalar_lea.vmem %s680_s12, 512  ;;  %p1043_p3 = scmp.lt.s32.totalorder %s680_s12, %s680_s12 }
  0x52   :  { %783 = vmatpush3.bf16.msra.mxu0 %v858_v2  ;;  %v881_v18 = vld [vmem:[#allocation8 + $0x24] ss:$8 sps:$4 sm:$0xff]   ;;  %v883_v21 = vld [vmem:[#allocation8 + $0x20] ss:$8 sps:$4 sm:$0xff]   ;;  %v884_v22 = vld [vmem:[#allocation8 + $0x14] ss:$8 sps:$4 sm:$0xff]   ;;  %p1039_p2 = scmp.ne.s32.totalorder %s680_s12, %s1038_s14  ;;  %p1044_p4 = scmp.lt.s32.totalorder %s1038_s14, %s1038_s14 }
  0x53   :  { %784 = vmatprep.subr.bf16.mxu0 %v1100_v0  ;;  %356 = vmatpush1.bf16.msra.mxu1 %v871_v8  ;;  %v864_v19 = vld [vmem:[#allocation7] sm:$0xff]   ;;  %v865_v20 = vld [vmem:[#allocation2] sm:$0xff]   ;;  %v886_v23 = vld [vmem:[#allocation8 + $0x10] ss:$8 sps:$4 sm:$0xff]   ;;  %v265_v52 = vsub.s32 0, %v264_v51  ;;  %v269_v54 = vsub.s32 1, %v264_v51 }
  0x54   :  { %357 = vmatprep.subr.bf16.mxu1 %v872_v9  ;;  %v887_v24 = vld [vmem:[#allocation8 + $0x4] ss:$8 sps:$4 sm:$0xff]   ;;  %v889_v25 = vld [vmem:[#allocation8] ss:$8 sps:$4 sm:$0xff]   ;;  %v890_v37 = vld [vmem:[#allocation10 + $0x38] sm:$0xff]   ;;  %p1045_p5 = por %p1044_p4, %p1043_p3 }
  0x55   :  { %v698_v27 = vld [vmem:[%s1251_s3] ss:$0 sm:$0xff]  ;;  %v891_v38 = vld [vmem:[#allocation10 + $0x30] sm:$0xff]   ;;  %v893_v40 = vld [vmem:[#allocation10 + $0x20] sm:$0xff]  }
  0x56   :  { %785 = vmatpush3.bf16.msra.mxu0 %v859_v3  ;;  %v892_v39 = vld [vmem:[#allocation10 + $0x28] sm:$0xff]   ;;  %v894_v41 = vld [vmem:[#allocation10 + $0x18] sm:$0xff]   ;;  %v895_v42 = vld [vmem:[#allocation10 + $0x10] sm:$0xff]   ;;  %p1046_p6 = pnand %p1045_p5, %p1039_p2 }
  0x57   :  { %786 = vmatprep.subr.bf16.mxu0 %v1100_v0  ;;  %358 = vmatpush1.bf16.msra.mxu1 %v874_v12  ;;  %v896_v43 = vld [vmem:[#allocation10 + $0x8] sm:$0xff]   ;;  %v897_v44 = vld [vmem:[#allocation10] sm:$0xff]   ;;  %v898_v45 = vld [vmem:[#allocation11 + $0x38] sm:$0xff]  }
  0x58   :  { %359 = vmatprep.subr.bf16.mxu1 %v875_v13  ;;  %v899_v46 = vld [vmem:[#allocation11 + $0x30] sm:$0xff]   ;;  %v900_v47 = vld [vmem:[#allocation11 + $0x28] sm:$0xff]   ;;  %v901_v48 = vld [vmem:[#allocation11 + $0x20] sm:$0xff]  }
  0x59   :  { %v902_v49 = vld [vmem:[#allocation11 + $0x18] sm:$0xff]   ;;  %v261_v53 = vld [vmem:[%s1253_s5] sm:$0x3]  ;;  %v402_v7 = vld [vmem:[#allocation5] sm:$0xff] }
  0x5a   :  { %787 = vmatpush3.bf16.msra.mxu0 %v860_v4  ;;  %v266_v55 = vrot.slane %v261_v53, %v265_v52  ;;  %v270_v56 = vrot.slane %v261_v53, %v269_v54  ;;  %v403_v8 = vld [vmem:[#allocation5 + $0x8] sm:$0xff] }
  0x5b   :  { %788 = vmatprep.subr.bf16.mxu0 %v1100_v0  ;;  %360 = vmatpush1.bf16.msra.mxu1 %v877_v14 }
  0x5c   :  { %361 = vmatprep.subr.bf16.mxu1 %v878_v15  ;;  %v903_v15 = vld [vmem:[#allocation11 + $0x10] sm:$0xff]  }
  0x5e   :  { %789 = vmatpush3.bf16.msra.mxu0 %v861_v10 }
  0x5f   :  { %790 = vmatprep.subr.bf16.mxu0 %v1100_v0  ;;  %362 = vmatpush1.bf16.msra.mxu1 %v880_v17  ;;  %v905_v17 = vld [vmem:[#allocation11] sm:$0xff]  }
  0x60   :  { %363 = vmatprep.subr.bf16.mxu1 %v881_v18  ;;  %v724_v18 = vld [vmem:[%s1255_s7] ss:$0 sm:$0xff] }
  0x62   :  { %791 = vmatpush3.bf16.msra.mxu0 %v862_v11 }
  0x63   :  { %792 = vmatprep.subr.bf16.mxu0 %v1100_v0  ;;  %364 = vmatpush1.bf16.msra.mxu1 %v883_v21 }
  0x64   :  { %365 = vmatprep.subr.bf16.mxu1 %v884_v22 }
  0x66   :  { %793 = vmatpush3.bf16.msra.mxu0 %v863_v16  ;;  %v904_v16 = vld [vmem:[#allocation11 + $0x8] sm:$0xff]  }
  0x67   :  { %794 = vmatprep.subr.bf16.mxu0 %v1100_v0  ;;  %366 = vmatpush1.bf16.msra.mxu1 %v886_v23 }
  0x68   :  { %367 = vmatprep.subr.bf16.mxu1 %v887_v24 }
  0x6a   :  { %795 = vmatpush3.bf16.msra.mxu0 %v864_v19 }
  0x6b   :  { %800 = vmatprep.subr.bf16.mxu0 %v1100_v0  ;;  %368 = vmatpush1.bf16.msra.mxu1 %v889_v25 }
  0x6c   :  { %820 = vmatprep.subr.bf16.mxu1 %v1100_v0 }
  0x6d   :  { %797 = vmatmul.mubr.bf16.vlgmr.msra.gmra.mxu0 %v865_v20 }
  0x6e   :  { %816 = vmatprep.mubr.msk.bf16.mxu0 %vm1101_vm0, %v1100_v0  ;;  %801 = vmatpush3.bf16.msra.mxu0 %v890_v37 }
  0x6f   :  { %802 = vmatprep.subr.bf16.mxu0 %v1100_v0 }
  0x72   :  { %803 = vmatpush3.bf16.msra.mxu0 %v891_v38 }
  0x73   :  { %804 = vmatprep.subr.bf16.mxu0 %v1100_v0 }
  0x76   :  { %805 = vmatpush3.bf16.msra.mxu0 %v892_v39 }
  0x77   :  { %806 = vmatprep.subr.bf16.mxu0 %v1100_v0 }
  0x7a   :  { %807 = vmatpush3.bf16.msra.mxu0 %v893_v40 }
  0x7b   :  { %808 = vmatprep.subr.bf16.mxu0 %v1100_v0 }
  0x7e   :  { %809 = vmatpush3.bf16.msra.mxu0 %v894_v41 }
  0x7f   :  { %810 = vmatprep.subr.bf16.mxu0 %v1100_v0 }
  0x82   :  { %811 = vmatpush3.bf16.msra.mxu0 %v895_v42 }
  0x83   :  { %812 = vmatprep.subr.bf16.mxu0 %v1100_v0 }
  0x86   :  { %813 = vmatpush3.bf16.msra.mxu0 %v896_v43 }
  0x87   :  { %814 = vmatprep.subr.bf16.mxu0 %v1100_v0 }
  0x8a   :  { %815 = vmatpush3.bf16.msra.mxu0 %v897_v44 }
 0x12d   :  { %v235_v28 = vpop.f32.mrf.mxu0 }
 0x12e   :  { %v236_v30 = vadd.f32 %v698_v27, %v235_v28 }
 0x12f   :  { %v798_v29 = vpop.f32.mrf.mxu0 }
 0x130   :  { %v242_v34 = vmax.f32 %v236_v30, 0.0 }
 0x131   :  { %v238_v31 = vpop.f32.mrf.mxu0 }
 0x132   :  { %v239_v32 = vadd.f32 %v698_v27, %v238_v31 }
 0x133   :  { %v799_v33 = vpop.f32.mrf.mxu0 }
 0x134   :  { %v243_v35 = vmax.f32 %v239_v32, 0.0 }
 0x136   :  { %v244_v36 = vpack.c.bf16 %v243_v35, %v242_v34 }
 0x138   :  { %386 = vmatmul.mubr.bf16.vlgmr.msra.gmra.mxu1 %v244_v36 }
 0x139   :  { %836 = vmatprep.mubr.msk.bf16.mxu1 %vm1101_vm0, %v1100_v0  ;;  %821 = vmatpush3.bf16.msra.mxu1 %v898_v45 }
 0x13a   :  { %822 = vmatprep.subr.bf16.mxu1 %v1100_v0 }
 0x13d   :  { %823 = vmatpush3.bf16.msra.mxu1 %v899_v46 }
 0x13e   :  { %824 = vmatprep.subr.bf16.mxu1 %v1100_v0 }
 0x141   :  { %825 = vmatpush3.bf16.msra.mxu1 %v900_v47 }
 0x142   :  { %826 = vmatprep.subr.bf16.mxu1 %v1100_v0 }
 0x145   :  { %827 = vmatpush3.bf16.msra.mxu1 %v901_v48 }
 0x146   :  { %828 = vmatprep.subr.bf16.mxu1 %v1100_v0 }
 0x149   :  { %829 = vmatpush3.bf16.msra.mxu1 %v902_v49 }
 0x14a   :  { %830 = vmatprep.subr.bf16.mxu1 %v1100_v0 }
 0x14d   :  { %831 = vmatpush3.bf16.msra.mxu1 %v903_v15 }
 0x14e   :  { %832 = vmatprep.subr.bf16.mxu1 %v1100_v0 }
 0x151   :  { %833 = vmatpush3.bf16.msra.mxu1 %v904_v16 }
 0x152   :  { %834 = vmatprep.subr.bf16.mxu1 %v1100_v0 }
 0x155   :  { %835 = vmatpush3.bf16.msra.mxu1 %v905_v17 }
 0x1f8   :  { %v387_v57 = vpop.f32.mrf.mxu1 }
 0x1f9   :  { %v388_v58 = vadd.f32 %v387_v57, %v266_v55 }
 0x1fa   :  { %v389_v59 = vpop.f32.mrf.mxu1 }
 0x1fb   :  { %658 = vst [vmem:[#allocation14] sm:$0xff] %v388_v58  ;;  %v390_v60 = vadd.f32 %v389_v59, %v270_v56 }
 0x1fc   :  { %v391_v61 = vpop.f32.mrf.mxu1 }
 0x1fd   :  { %v396_v62 = vmul.f32 0.5, %v390_v60  ;;  %659 = vst [vmem:[#allocation14 + $0x8] sm:$0xff] %v390_v60  ;;  %v392_v63 = vadd.f32 %v391_v61, %v266_v55 }
 0x1fe   :  { %v393_v1 = vpop.f32.mrf.mxu1 }
 0x1ff   :  { %v398_v2 = vmul.f32 1.442695, %v396_v62  ;;  %660 = vst [vmem:[#allocation14 + $0x10] sm:$0xff] %v392_v63  ;;  %v394_v3 = vadd.f32 %v393_v1, %v270_v56 }
 0x201   :  { %906 = vpow2.f32 %v398_v2  ;;  %v397_v4 = vmul.f32 0.5, %v394_v3  ;;  %661 = vst [vmem:[#allocation14 + $0x18] sm:$0xff] %v394_v3 }
 0x203   :  { %v400_v5 = vmul.f32 1.442695, %v397_v4 }
 0x205   :  { %908 = vpow2.f32 %v400_v5 }
 0x20e   :  { %v907_v6 = vpop.eup %906 }
 0x20f   :  { %v404_v9 = vmul.f32 %v907_v6, %v402_v7 }
 0x211   :  { %v406_v12 = vadd.f32 %v404_v9, %v388_v58 }
 0x212   :  { %v909_v10 = vpop.eup %908 }
 0x213   :  { %v405_v11 = vmul.f32 %v909_v10, %v403_v8 }
 0x215   :  { %v407_v13 = vadd.f32 %v405_v11, %v392_v63 }
 0x217   :  { %v408_v14 = vpack.c.bf16 %v407_v13, %v406_v12 }
 0x219   :  { %817 = vmatmul.mubr.bf16.vlgmr.msra.gmra.mxu0 %v408_v14 }
 0x2d9   :  { %v514_v19 = vpop.f32.mrf.mxu0 }
 0x2da   :  { %v515_v21 = vadd.f32 %v724_v18, %v514_v19 }
 0x2db   :  { %v818_v20 = vpop.f32.mrf.mxu0 }
 0x2dc   :  { %v521_v25 = vmax.f32 %v515_v21, 0.0 }
 0x2dd   :  { %v517_v22 = vpop.f32.mrf.mxu0 }
 0x2de   :  { %v518_v23 = vadd.f32 %v724_v18, %v517_v22 }
 0x2df   :  { %v819_v24 = vpop.f32.mrf.mxu0 }
 0x2e0   :  { %v522_v26 = vmax.f32 %v518_v23, 0.0 }
 0x2e2   :  { %v523_v27 = vpack.c.bf16 %v522_v26, %v521_v25 }
 0x2e4   :  { %837 = vmatmul.mubr.bf16.vlgmr.msra.gmra.mxu1 %v523_v27 }
 0x2e5   :  { %1049 = shalt.err (!%p1046_p6)
}
 0x2e6   :  { %s1104_s7 = smov 256   ;;  %s1105_s15 = smov 16   ;;  %v733_v0 = vld [vmem:[%s1257_s9] ss:$0 sm:$0xff] }
 0x2e7   :  { %685 = dma.vmem_to_hbm [thread:$0]  %s680_s12, 512, %s1259_s11, [#allocation15], %s1104_s7, %s1104_s7, %s1105_s15  }
 0x2e8   :  { %s1106_s11 = smov [#allocation13]  }
 0x2e9   :  { %s667_s19 = sshll.u32 %s1106_s11, 4  ;;  %s668_s19 = int_to_ptr.vmem [resolvable:$true] %s667_s19 }
 0x2ea   :  { %s1058_s9 = scalar_lea.vmem %s668_s19, 128  ;;  %p1063_p8 = scmp.lt.s32.totalorder %s668_s19, %s668_s19 }
 0x2eb   :  { %p1059_p7 = scmp.ne.s32.totalorder %s668_s19, %s1058_s9  ;;  %p1064_p9 = scmp.lt.s32.totalorder %s1058_s9, %s1058_s9 }
 0x2ed   :  { %p1065_p10 = por %p1064_p9, %p1063_p8 }
 0x2ef   :  { %p1066_p11 = pnand %p1065_p10, %p1059_p7 }
 0x3a4   :  { %v629_v28 = vpop.f32.mrf.mxu1 }
 0x3a5   :  { %v630_v29 = vadd.f32 %v733_v0, %v629_v28 }
 0x3a6   :  { %v838_v30 = vpop.f32.mrf.mxu1 }
 0x3a7   :  { %v742_v31 = vmul.f32 -1.442695, %v630_v29 }
 0x3a8   :  { %v632_v32 = vpop.f32.mrf.mxu1 }
 0x3a9   :  { %910 = vpow2.f32 %v742_v31  ;;  %v633_v33 = vadd.f32 %v733_v0, %v632_v32 }
 0x3aa   :  { %v839_v34 = vpop.f32.mrf.mxu1 }
 0x3ab   :  { %v743_v35 = vmul.f32 -1.442695, %v633_v33 }
 0x3ad   :  { %912 = vpow2.f32 %v743_v35 }
 0x3b6   :  { %v911_v36 = vpop.eup %910 }
 0x3b7   :  { %v642_v37 = vadd.f32 1.0, %v911_v36 }
 0x3b9   :  { %914 = vrcp.f32 %v642_v37 }
 0x3ba   :  { %v913_v38 = vpop.eup %912 }
 0x3bb   :  { %v643_v39 = vadd.f32 1.0, %v913_v38 }
 0x3bd   :  { %916 = vrcp.f32 %v643_v39 }
 0x3c6   :  { %v915_v40 = vpop.eup %914 }
 0x3ca   :  { %v917_v41 = vpop.eup %916 }
 0x3cb   :  { %v751_v42 = vpack.c.bf16 %v917_v41, %v915_v40 }
 0x3cd   :  { %752 = vst [vmem:[#allocation13] sm:$0xff] %v751_v42  }
 0x3ce   :  { %1069 = shalt.err (!%p1066_p11)
}
 0x3cf   :  { %673 = dma.vmem_to_hbm [thread:$0]  %s668_s19, 128, %s1258_s10, [#allocation4], %s1095_s1, %s1095_s1, %s1096_s13  }
 0x3d0   :  { %1086 = dma.done.wait [#allocation4], 128  }
 0x3d1   :  { %1087 = vsyncadd [#allocation4], 4294967168 }
 0x3d2   :  { %1088 = dma.done.wait [#allocation15], 512  }
 0x3d3   :  { %1089 = vsyncadd [#allocation15], 4294966784 }
 0x3d4   :  { %692 = vsyncpa [#allocation3], 1 }
 0x3d5   :  { %693 = vsyncpa [#allocation6], 1 }
 0x3d6   :  { %694 = vsyncpa [#allocation9], 1 }
 0x3d7   :  { %695 = vsyncpa [#allocation12], 1 }
 0x3d8   :  { %696 = vsyncpa [#allocation4], 1 }
 0x3d9   :  { %697 = vsyncpa [#allocation15], 1 }

</bundles_post_ra>
